<compile_context>
chip_gen: v5e
topology: v5e:2x2
jax: 0.10.0
libtpu: 0.0.40
codegen_flags: <defaults>
</compile_context>

<pallas_src>
import functools

import jax
import jax.numpy as jnp
from jax.experimental import pallas as pl
from jax.experimental.pallas import tpu as pltpu

BN_EPS = 1e-5
LEAKY_SLOPE = 0.01   # torch.nn.LeakyReLU default negative_slope
LANE = 128           # TPU lane width: pad every feature/hidden/output dim to this


def _round_up(n, m):
    return ((n + m - 1) // m) * m


@functools.lru_cache(maxsize=1)
def _vmem_budget_bytes():
    """Generation-aware usable-VMEM budget (compiler limit == Python guard)."""
    try:
        cap = int(pltpu.get_tpu_info().vmem_capacity_bytes)
    except Exception:
        cap = 64 << 20  # conservative fallback: v7x per-TensorCore VMEM
    # Leave headroom for Mosaic internal scratch: ~56 MiB on v7x, ~112 MiB on v5e/v6e.
    return min((cap * 7) // 8, cap - (8 << 20))


def _leaky_relu(h):
    # max(h, a*h) == LeakyReLU(h) for 0 < a < 1; avoids a select.
    return jnp.maximum(h, LEAKY_SLOPE * h)


def _bn_act(h, gamma, beta):
    """Training-mode BatchNorm1d fused into one affine (f32 stats), then LeakyReLU.

    One-pass statistics (E[h^2] - mean^2), clamped at 0 against cancellation.
    Padded columns are exactly zero and have gamma == beta == 0, so they stay
    exactly zero through the whole network.
    """
    # TODO(synk): at large B, move the two column sums onto the MXU
    # (ones(1,B) @ h and ones(1,B) @ (h*h)) to relieve the VALU/XLU sublane
    # reductions; at small B the jnp.mean path is cheaper.
    mean = jnp.mean(h, axis=0, keepdims=True)
    msq = jnp.mean(h * h, axis=0, keepdims=True)
    var = jnp.maximum(msq - mean * mean, 0.0)   # biased variance (torch training mode)
    scale = gamma * jax.lax.rsqrt(var + BN_EPS)
    shift = beta - mean * scale
    return _leaky_relu(h * scale + shift)


def ffnn_kernel(x_ref, w1_ref, w2_ref, w3_ref, w4_ref, vec_ref, out_ref):
    # x_ref: bf16 (B, Fp) lane-dense.  w*_ref: bf16, 128-padded.
    # vec_ref rows: [g1, be1, g2, be2, g3, be3, b4, zero-pad] in f32.
    x = x_ref[...]
    vec = vec_ref[...]
    h1p = w1_ref.shape[1]
    h2p = w2_ref.shape[1]
    h3p = w3_ref.shape[1]
    op = w4_ref.shape[1]

    # Block 1: linear1 (bias dropped: cancelled by training-mode BN) -> BN ->
    # LeakyReLU -> dropout(identity).  MXU gets bf16 operands, f32 accumulate.
    h = jnp.dot(x, w1_ref[...], preferred_element_type=jnp.float32)
    h = _bn_act(h, vec[0:1, :h1p], vec[1:2, :h1p])

    # Block 2
    h = jnp.dot(h.astype(jnp.bfloat16), w2_ref[...],
                preferred_element_type=jnp.float32)
    h = _bn_act(h, vec[2:3, :h2p], vec[3:4, :h2p])

    # Block 3
    h = jnp.dot(h.astype(jnp.bfloat16), w3_ref[...],
                preferred_element_type=jnp.float32)
    h = _bn_act(h, vec[4:5, :h3p], vec[5:6, :h3p])

    # Output layer keeps its bias (added in f32).  op is a multiple of 128 ->
    # lane-dense, unmasked store.
    out = jnp.dot(h.astype(jnp.bfloat16), w4_ref[...],
                  preferred_element_type=jnp.float32)
    out_ref[...] = (out + vec[6:7, :op]).astype(out_ref.dtype)


def _full_spec(shape):
    # Whole-array block, gridless call: single invocation, no pipeline buffers.
    return pl.BlockSpec(shape, lambda: (0,) * len(shape))


@functools.partial(jax.jit, static_argnames=("num_output",))
def ffnn_forward(x, kparams, num_output):
    """x: (B, F) float32.  kparams: padded/packed params from pack_params()."""
    B, F = x.shape
    w1, w2, w3, w4, vec = (kparams[k] for k in ("w1", "w2", "w3", "w4", "vec"))
    fp, op = w1.shape[0], w4.shape[1]

    # Lane-dense contraction dim for layer 1: pad the feature axis to the
    # padded w1 row count; cast to bf16 so the MXU gets native operands and
    # x's DMA / VMEM footprint halves.
    x_p = jnp.pad(x, ((0, 0), (0, fp - F))).astype(jnp.bfloat16)

    # Residency guard, consistent with the compiler VMEM limit below.
    vmem_budget = _vmem_budget_bytes()
    widths = (fp, w1.shape[1], w2.shape[1], w3.shape[1], op)
    io_bytes = (x_p.size * 2
                + 2 * (w1.size + w2.size + w3.size + w4.size)   # bf16 weights
                + vec.size * 4
                + B * op * 4)                                    # f32 output
    act_bytes = B * max(widths) * (4 + 2)   # live f32 h + its bf16 copy
    needed = 2 * io_bytes + act_bytes       # 2x: conservative buffering allowance
    if needed > vmem_budget:
        raise ValueError(
            "Batch too large for the single-block training-mode BatchNorm kernel "
            f"(~{needed >> 20} MiB needed vs {vmem_budget >> 20} MiB VMEM budget); "
            "see TODO(synk) about the two-pass batch-tiled variant.")

    flops = 2 * B * (fp * w1.shape[1] + w1.shape[1] * w2.shape[1]
                     + w2.shape[1] * w3.shape[1] + w3.shape[1] * op)
    cost = pl.CostEstimate(flops=flops,
                           transcendentals=w1.shape[1] + w2.shape[1] + w3.shape[1],
                           bytes_accessed=io_bytes)

    args = (x_p, w1, w2, w3, w4, vec)
    out_padded = pl.pallas_call(
        ffnn_kernel,
        out_shape=jax.ShapeDtypeStruct((B, op), jnp.float32),
        in_specs=[_full_spec(a.shape) for a in args],
        out_specs=_full_spec((B, op)),
        compiler_params=pltpu.CompilerParams(vmem_limit_bytes=vmem_budget),
        cost_estimate=cost,
    )(*args)
    # Strip the output lane padding outside the kernel.
    return out_padded[:, :num_output]


def init_params(key, num_features, h1, h2, h3, num_output):
    """Deterministic PyTorch-style init.  Linear weights stored as (in, out)."""
    ks = jax.random.split(key, 8)

    def linear(kw, kb, fan_in, fan_out):
        bound = float(fan_in) ** -0.5
        w = jax.random.uniform(kw, (fan_in, fan_out), jnp.float32, -bound, bound)
        b = jax.random.uniform(kb, (fan_out,), jnp.float32, -bound, bound)
        return w, b

    w1, b1 = linear(ks[0], ks[1], num_features, h1)
    w2, b2 = linear(ks[2], ks[3], h1, h2)
    w3, b3 = linear(ks[4], ks[5], h2, h3)
    w4, b4 = linear(ks[6], ks[7], h3, num_output)

    return {
        "w1": w1, "b1": b1,
        "g1": jnp.ones((h1,), jnp.float32), "be1": jnp.zeros((h1,), jnp.float32),
        "w2": w2, "b2": b2,
        "g2": jnp.ones((h2,), jnp.float32), "be2": jnp.zeros((h2,), jnp.float32),
        "w3": w3, "b3": b3,
        "g3": jnp.ones((h3,), jnp.float32), "be3": jnp.zeros((h3,), jnp.float32),
        "w4": w4, "b4": b4,
    }


def pack_params(params):
    """Pad weights to lane-dense (multiple-of-128) bf16 layouts and pack the
    small per-layer vectors (gamma/beta x3 + output bias) into one (8, Vmax)
    f32 array.

    Padded weight rows/columns, gammas, betas and bias entries are zero, so
    padded lanes carry exact zeros through the network; the logical result is
    unchanged (the output is sliced back outside the kernel).  b1/b2/b3 are
    not packed: they are mathematically cancelled by the BatchNorm mean
    subtraction.
    """
    w1, w2, w3, w4 = params["w1"], params["w2"], params["w3"], params["w4"]
    fp = _round_up(w1.shape[0], LANE)
    h1p = _round_up(w1.shape[1], LANE)
    h2p = _round_up(w2.shape[1], LANE)
    h3p = _round_up(w3.shape[1], LANE)
    op = _round_up(w4.shape[1], LANE)
    vmax = max(h1p, h2p, h3p, op)

    def pad2(a, rows, cols):
        padded = jnp.pad(a, ((0, rows - a.shape[0]), (0, cols - a.shape[1])))
        return padded.astype(jnp.bfloat16)   # bf16 MXU operands

    def row(v):
        return jnp.pad(v.astype(jnp.float32), (0, vmax - v.shape[0]))

    vec = jnp.stack([
        row(params["g1"]), row(params["be1"]),
        row(params["g2"]), row(params["be2"]),
        row(params["g3"]), row(params["be3"]),
        row(params["b4"]), jnp.zeros((vmax,), jnp.float32),
    ])  # (8, vmax) f32

    return {
        "w1": pad2(w1, fp, h1p),
        "w2": pad2(w2, h1p, h2p),
        "w3": pad2(w3, h2p, h3p),
        "w4": pad2(w4, h3p, op),
        "vec": vec,
    }


def reference_forward(x, params):
    """Pure-JAX f32 reference with the exact PyTorch math (incl. pre-BN biases)."""
    def bn(h, g, b):
        m = jnp.mean(h, axis=0, keepdims=True)
        v = jnp.mean((h - m) ** 2, axis=0, keepdims=True)
        return (h - m) / jnp.sqrt(v + BN_EPS) * g + b

    def act(h):
        return jnp.where(h > 0, h, LEAKY_SLOPE * h)

    h = act(bn(x @ params["w1"] + params["b1"], params["g1"], params["be1"]))
    h = act(bn(h @ params["w2"] + params["b2"], params["g2"], params["be2"]))
    h = act(bn(h @ params["w3"] + params["b3"], params["g3"], params["be3"]))
    return h @ params["w4"] + params["b4"]


if __name__ == "__main__":
    B, F, H1, H2, H3, O = 16, 32, 64, 64, 32, 8
    # Dropout is identity here (eval semantics); BatchNorm uses batch stats
    # (training-mode default), matching the module's forward math sans dropout.

    key = jax.random.PRNGKey(0)
    kx, kp = jax.random.split(key)
    x = jax.random.normal(kx, (B, F), jnp.float32)

    params = init_params(kp, F, H1, H2, H3, O)   # logical (PyTorch-shaped) params
    kparams = pack_params(params)                # padded / packed bf16 kernel layout

    out = ffnn_forward(x, kparams, O)
    out = jax.block_until_ready(out)

    ref = reference_forward(x, params)           # f32 reference
    assert out.shape == (B, O)
    # bf16 matmul operands (f32 accumulate / f32 BN stats) -> tolerance loosened.
    assert jnp.allclose(out, ref, atol=5e-2, rtol=5e-2), "mismatch vs reference"

    print("KERNEL_OK")
</pallas_src>

<mosaic_0001>
module attributes {stable_mosaic.version = 11 : i64} {
  func.func @ffnn_kernel(%arg0: memref<16x128xbf16, #tpu.memory_space<vmem>>, %arg1: memref<128x128xbf16, #tpu.memory_space<vmem>>, %arg2: memref<128x128xbf16, #tpu.memory_space<vmem>>, %arg3: memref<128x128xbf16, #tpu.memory_space<vmem>>, %arg4: memref<128x128xbf16, #tpu.memory_space<vmem>>, %arg5: memref<8x128xf32, #tpu.memory_space<vmem>>, %arg6: memref<16x128xf32, #tpu.memory_space<vmem>>) attributes {dimension_semantics = [], scalar_prefetch = 0 : i64, scratch_operands = 0 : i64, tpu.core_type = #tpu.core_type<tc>} {
    %c0 = arith.constant 0 : index
    %c0_0 = arith.constant 0 : index
    %0 = vector.load %arg0[%c0, %c0_0] : memref<16x128xbf16, #tpu.memory_space<vmem>>, vector<16x128xbf16>
    %c0_1 = arith.constant 0 : index
    %c0_2 = arith.constant 0 : index
    %1 = vector.load %arg5[%c0_1, %c0_2] : memref<8x128xf32, #tpu.memory_space<vmem>>, vector<8x128xf32>
    %c0_3 = arith.constant 0 : index
    %c0_4 = arith.constant 0 : index
    %2 = vector.load %arg1[%c0_3, %c0_4] : memref<128x128xbf16, #tpu.memory_space<vmem>>, vector<128x128xbf16>
    %cst = arith.constant dense<0.000000e+00> : vector<16x128xf32>
    %3 = tpu.matmul %0, %2, %cst {dimension_numbers = #tpu.dot_dimension_numbers<[1], [0], [0], [1], [0, 0, 1, 1], [], []>} : vector<16x128xbf16>, vector<128x128xbf16>, vector<16x128xf32> -> vector<16x128xf32>
    %4 = vector.extract_strided_slice %1 {offsets = [0, 0], sizes = [1, 128], strides = [1, 1]} : vector<8x128xf32> to vector<1x128xf32>
    %5 = vector.extract_strided_slice %1 {offsets = [1, 0], sizes = [1, 128], strides = [1, 1]} : vector<8x128xf32> to vector<1x128xf32>
    %cst_5 = arith.constant dense<0.000000e+00> : vector<128xf32>
    %6 = vector.multi_reduction <add>, %3, %cst_5 [0] : vector<16x128xf32> to vector<128xf32>
    %7 = vector.shape_cast %6 : vector<128xf32> to vector<1x128xf32>
    %cst_6 = arith.constant 1.600000e+01 : f32
    %8 = vector.broadcast %cst_6 : f32 to vector<1x128xf32>
    %9 = arith.divf %7, %8 : vector<1x128xf32>
    %10 = arith.mulf %3, %3 : vector<16x128xf32>
    %cst_7 = arith.constant dense<0.000000e+00> : vector<128xf32>
    %11 = vector.multi_reduction <add>, %10, %cst_7 [0] : vector<16x128xf32> to vector<128xf32>
    %12 = vector.shape_cast %11 : vector<128xf32> to vector<1x128xf32>
    %cst_8 = arith.constant 1.600000e+01 : f32
    %13 = vector.broadcast %cst_8 : f32 to vector<1x128xf32>
    %14 = arith.divf %12, %13 : vector<1x128xf32>
    %15 = arith.mulf %9, %9 : vector<1x128xf32>
    %16 = arith.subf %14, %15 : vector<1x128xf32>
    %cst_9 = arith.constant 0.000000e+00 : f32
    %17 = vector.broadcast %cst_9 : f32 to vector<1x128xf32>
    %18 = arith.maximumf %16, %17 : vector<1x128xf32>
    %cst_10 = arith.constant 9.99999974E-6 : f32
    %19 = vector.broadcast %cst_10 : f32 to vector<1x128xf32>
    %20 = arith.addf %18, %19 : vector<1x128xf32>
    %21 = math.rsqrt %20 : vector<1x128xf32>
    %22 = arith.mulf %4, %21 : vector<1x128xf32>
    %23 = arith.mulf %9, %22 : vector<1x128xf32>
    %24 = arith.subf %5, %23 : vector<1x128xf32>
    %25 = vector.broadcast %22 : vector<1x128xf32> to vector<16x128xf32>
    %26 = arith.mulf %3, %25 : vector<16x128xf32>
    %27 = vector.broadcast %24 : vector<1x128xf32> to vector<16x128xf32>
    %28 = arith.addf %26, %27 : vector<16x128xf32>
    %cst_11 = arith.constant 0.00999999977 : f32
    %29 = vector.broadcast %cst_11 : f32 to vector<16x128xf32>
    %30 = arith.mulf %29, %28 : vector<16x128xf32>
    %31 = arith.maximumf %28, %30 : vector<16x128xf32>
    %32 = arith.truncf %31 : vector<16x128xf32> to vector<16x128xbf16>
    %c0_12 = arith.constant 0 : index
    %c0_13 = arith.constant 0 : index
    %33 = vector.load %arg2[%c0_12, %c0_13] : memref<128x128xbf16, #tpu.memory_space<vmem>>, vector<128x128xbf16>
    %cst_14 = arith.constant dense<0.000000e+00> : vector<16x128xf32>
    %34 = tpu.matmul %32, %33, %cst_14 {dimension_numbers = #tpu.dot_dimension_numbers<[1], [0], [0], [1], [0, 0, 1, 1], [], []>} : vector<16x128xbf16>, vector<128x128xbf16>, vector<16x128xf32> -> vector<16x128xf32>
    %35 = vector.extract_strided_slice %1 {offsets = [2, 0], sizes = [1, 128], strides = [1, 1]} : vector<8x128xf32> to vector<1x128xf32>
    %36 = vector.extract_strided_slice %1 {offsets = [3, 0], sizes = [1, 128], strides = [1, 1]} : vector<8x128xf32> to vector<1x128xf32>
    %cst_15 = arith.constant dense<0.000000e+00> : vector<128xf32>
    %37 = vector.multi_reduction <add>, %34, %cst_15 [0] : vector<16x128xf32> to vector<128xf32>
    %38 = vector.shape_cast %37 : vector<128xf32> to vector<1x128xf32>
    %cst_16 = arith.constant 1.600000e+01 : f32
    %39 = vector.broadcast %cst_16 : f32 to vector<1x128xf32>
    %40 = arith.divf %38, %39 : vector<1x128xf32>
    %41 = arith.mulf %34, %34 : vector<16x128xf32>
    %cst_17 = arith.constant dense<0.000000e+00> : vector<128xf32>
    %42 = vector.multi_reduction <add>, %41, %cst_17 [0] : vector<16x128xf32> to vector<128xf32>
    %43 = vector.shape_cast %42 : vector<128xf32> to vector<1x128xf32>
    %cst_18 = arith.constant 1.600000e+01 : f32
    %44 = vector.broadcast %cst_18 : f32 to vector<1x128xf32>
    %45 = arith.divf %43, %44 : vector<1x128xf32>
    %46 = arith.mulf %40, %40 : vector<1x128xf32>
    %47 = arith.subf %45, %46 : vector<1x128xf32>
    %cst_19 = arith.constant 0.000000e+00 : f32
    %48 = vector.broadcast %cst_19 : f32 to vector<1x128xf32>
    %49 = arith.maximumf %47, %48 : vector<1x128xf32>
    %cst_20 = arith.constant 9.99999974E-6 : f32
    %50 = vector.broadcast %cst_20 : f32 to vector<1x128xf32>
    %51 = arith.addf %49, %50 : vector<1x128xf32>
    %52 = math.rsqrt %51 : vector<1x128xf32>
    %53 = arith.mulf %35, %52 : vector<1x128xf32>
    %54 = arith.mulf %40, %53 : vector<1x128xf32>
    %55 = arith.subf %36, %54 : vector<1x128xf32>
    %56 = vector.broadcast %53 : vector<1x128xf32> to vector<16x128xf32>
    %57 = arith.mulf %34, %56 : vector<16x128xf32>
    %58 = vector.broadcast %55 : vector<1x128xf32> to vector<16x128xf32>
    %59 = arith.addf %57, %58 : vector<16x128xf32>
    %cst_21 = arith.constant 0.00999999977 : f32
    %60 = vector.broadcast %cst_21 : f32 to vector<16x128xf32>
    %61 = arith.mulf %60, %59 : vector<16x128xf32>
    %62 = arith.maximumf %59, %61 : vector<16x128xf32>
    %63 = arith.truncf %62 : vector<16x128xf32> to vector<16x128xbf16>
    %c0_22 = arith.constant 0 : index
    %c0_23 = arith.constant 0 : index
    %64 = vector.load %arg3[%c0_22, %c0_23] : memref<128x128xbf16, #tpu.memory_space<vmem>>, vector<128x128xbf16>
    %cst_24 = arith.constant dense<0.000000e+00> : vector<16x128xf32>
    %65 = tpu.matmul %63, %64, %cst_24 {dimension_numbers = #tpu.dot_dimension_numbers<[1], [0], [0], [1], [0, 0, 1, 1], [], []>} : vector<16x128xbf16>, vector<128x128xbf16>, vector<16x128xf32> -> vector<16x128xf32>
    %66 = vector.extract_strided_slice %1 {offsets = [4, 0], sizes = [1, 128], strides = [1, 1]} : vector<8x128xf32> to vector<1x128xf32>
    %67 = vector.extract_strided_slice %1 {offsets = [5, 0], sizes = [1, 128], strides = [1, 1]} : vector<8x128xf32> to vector<1x128xf32>
    %cst_25 = arith.constant dense<0.000000e+00> : vector<128xf32>
    %68 = vector.multi_reduction <add>, %65, %cst_25 [0] : vector<16x128xf32> to vector<128xf32>
    %69 = vector.shape_cast %68 : vector<128xf32> to vector<1x128xf32>
    %cst_26 = arith.constant 1.600000e+01 : f32
    %70 = vector.broadcast %cst_26 : f32 to vector<1x128xf32>
    %71 = arith.divf %69, %70 : vector<1x128xf32>
    %72 = arith.mulf %65, %65 : vector<16x128xf32>
    %cst_27 = arith.constant dense<0.000000e+00> : vector<128xf32>
    %73 = vector.multi_reduction <add>, %72, %cst_27 [0] : vector<16x128xf32> to vector<128xf32>
    %74 = vector.shape_cast %73 : vector<128xf32> to vector<1x128xf32>
    %cst_28 = arith.constant 1.600000e+01 : f32
    %75 = vector.broadcast %cst_28 : f32 to vector<1x128xf32>
    %76 = arith.divf %74, %75 : vector<1x128xf32>
    %77 = arith.mulf %71, %71 : vector<1x128xf32>
    %78 = arith.subf %76, %77 : vector<1x128xf32>
    %cst_29 = arith.constant 0.000000e+00 : f32
    %79 = vector.broadcast %cst_29 : f32 to vector<1x128xf32>
    %80 = arith.maximumf %78, %79 : vector<1x128xf32>
    %cst_30 = arith.constant 9.99999974E-6 : f32
    %81 = vector.broadcast %cst_30 : f32 to vector<1x128xf32>
    %82 = arith.addf %80, %81 : vector<1x128xf32>
    %83 = math.rsqrt %82 : vector<1x128xf32>
    %84 = arith.mulf %66, %83 : vector<1x128xf32>
    %85 = arith.mulf %71, %84 : vector<1x128xf32>
    %86 = arith.subf %67, %85 : vector<1x128xf32>
    %87 = vector.broadcast %84 : vector<1x128xf32> to vector<16x128xf32>
    %88 = arith.mulf %65, %87 : vector<16x128xf32>
    %89 = vector.broadcast %86 : vector<1x128xf32> to vector<16x128xf32>
    %90 = arith.addf %88, %89 : vector<16x128xf32>
    %cst_31 = arith.constant 0.00999999977 : f32
    %91 = vector.broadcast %cst_31 : f32 to vector<16x128xf32>
    %92 = arith.mulf %91, %90 : vector<16x128xf32>
    %93 = arith.maximumf %90, %92 : vector<16x128xf32>
    %94 = arith.truncf %93 : vector<16x128xf32> to vector<16x128xbf16>
    %c0_32 = arith.constant 0 : index
    %c0_33 = arith.constant 0 : index
    %95 = vector.load %arg4[%c0_32, %c0_33] : memref<128x128xbf16, #tpu.memory_space<vmem>>, vector<128x128xbf16>
    %cst_34 = arith.constant dense<0.000000e+00> : vector<16x128xf32>
    %96 = tpu.matmul %94, %95, %cst_34 {dimension_numbers = #tpu.dot_dimension_numbers<[1], [0], [0], [1], [0, 0, 1, 1], [], []>} : vector<16x128xbf16>, vector<128x128xbf16>, vector<16x128xf32> -> vector<16x128xf32>
    %97 = vector.extract_strided_slice %1 {offsets = [6, 0], sizes = [1, 128], strides = [1, 1]} : vector<8x128xf32> to vector<1x128xf32>
    %98 = vector.broadcast %97 : vector<1x128xf32> to vector<16x128xf32>
    %99 = arith.addf %96, %98 : vector<16x128xf32>
    %c0_35 = arith.constant 0 : index
    %c0_36 = arith.constant 0 : index
    %100 = vector.load %arg6[%c0_35, %c0_36] : memref<16x128xf32, #tpu.memory_space<vmem>>, vector<16x128xf32>
    tpu.vector_store %arg6[%c0_35, %c0_36], %99 {strides = array<i32>} : memref<16x128xf32, #tpu.memory_space<vmem>>, vector<16x128xf32>,
    return
  }
}

</mosaic_0001>

<bundles_post_ra>
// kernel: ffnn_forward.1
= control target key start
LH: loop header
LB: loop body
LE: loop exit
PB: predicated region body
PF: predicated region fallthrough
CT: control target
= control target key end

     0   :  { %11 = vsyncpa [#allocation3], 0  ;;  %s942_s0 = inlined_call_operand.vmem [shape: bf16[16,128], index: 0, kind: input, shape index: {}]   ;;  %s943_s1 = inlined_call_operand.hbm [shape: bf16[128,128], index: 1, kind: input, shape index: {}]   ;;  %s944_s2 = inlined_call_operand.hbm [shape: bf16[128,128], index: 2, kind: input, shape index: {}]   ;;  %s945_s3 = inlined_call_operand.hbm [shape: bf16[128,128], index: 3, kind: input, shape index: {}]   ;;  %s946_s4 = inlined_call_operand.hbm [shape: bf16[128,128], index: 4, kind: input, shape index: {}]   ;;  %s947_s5 = inlined_call_operand.vmem [shape: f32[8,128], index: 5, kind: input, shape index: {}]   ;;  %s948_s6 = inlined_call_operand.vmem [shape: f32[16,128], index: 6, kind: output, shape index: {}]  }
   0x1   :  { %12 = vsyncpa [#allocation5], 0 }
   0x2   :  { %13 = vsyncpa [#allocation8], 0  ;;  %s33_s23 = sshll.u32 %s944_s2, 4  ;;  %s853_s24 = smov [#allocation4]   ;;  %s34_s23 = int_to_ptr.hbm [resolvable:$true] %s33_s23 }
   0x3   :  { %s35_s25 = sshll.u32 %s853_s24, 4  ;;  %s20_s28 = sshll.u32 %s943_s1, 4  ;;  %s36_s25 = int_to_ptr.vmem [resolvable:$true] %s35_s25  ;;  %s21_s28 = int_to_ptr.hbm [resolvable:$true] %s20_s28 }
   0x4   :  { %s854_s29 = smov 64   ;;  %s855_s30 = smov 4  }
   0x5   :  { %41 = dma.hbm_to_vmem [thread:$0]  %s34_s23, 1024, %s36_s25, [#allocation5], %s854_s29, %s854_s29, %s855_s30  }
   0x6   :  { %s856_s7 = smov [#allocation2]   ;;  %s46_s11 = sshll.u32 %s945_s3, 4  ;;  %s47_s11 = int_to_ptr.hbm [resolvable:$true] %s46_s11 }
   0x7   :  { %s22_s8 = sshll.u32 %s856_s7, 4  ;;  %s59_s13 = sshll.u32 %s946_s4, 4  ;;  %s23_s8 = int_to_ptr.vmem [resolvable:$true] %s22_s8  ;;  %s60_s13 = int_to_ptr.hbm [resolvable:$true] %s59_s13 }
   0x8   :  { %28 = dma.hbm_to_vmem [thread:$0]  %s21_s28, 1024, %s23_s8, [#allocation3], %s854_s29, %s854_s29, %s855_s30  }
   0x9   :  { %s857_s14 = smov [#allocation6]   ;;  %s858_s1 = smov [#allocation7]  }
   0xa   :  { %s48_s15 = sshll.u32 %s857_s14, 4  ;;  %s61_s16 = sshll.u32 %s858_s1, 4  ;;  %s49_s15 = int_to_ptr.vmem [resolvable:$true] %s48_s15  ;;  %s62_s16 = int_to_ptr.vmem [resolvable:$true] %s61_s16 }
   0xb   :  { %54 = dma.hbm_to_vmem [thread:$0]  %s47_s11, 1024, %s49_s15, [#allocation5], %s854_s29, %s854_s29, %s855_s30  }
   0xc   :  { %67 = dma.hbm_to_vmem [thread:$0]  %s60_s13, 1024, %s62_s16, [#allocation8], %s854_s29, %s854_s29, %s855_s30  }
   0xd   :  { %847 = dma.done.wait [#allocation3], 1024  }
   0xe   :  { %848 = vsyncadd [#allocation3], 4294966272 }
   0xf   :  { %849 = dma.done.wait [#allocation5], 2048  }
  0x10   :  { %850 = vsyncadd [#allocation5], 4294965248 }
  0x11   :  { %851 = dma.done.wait [#allocation8], 1024  }
  0x12   :  { %852 = vsyncadd [#allocation8], 4294966272  ;;  %v711_v0 = vld [vmem:[#allocation2 + $0x38] sm:$0xff]  ;;  %v710_v1 = vld [vmem:[#allocation2 + $0x30] sm:$0xff]  ;;  %v859_v9 = vmov 16.0  }
  0x13   :  { %159 = vmatpush.bf16.msra.mxu0 %v711_v0  ;;  %v709_v2 = vld [vmem:[#allocation2 + $0x28] sm:$0xff]  ;;  %v708_v3 = vld [vmem:[#allocation2 + $0x20] sm:$0xff]  ;;  %v707_v4 = vld [vmem:[#allocation2 + $0x18] sm:$0xff]  ;;  %743 = vrcp.f32 %v859_v9 }
  0x14   :  { %v706_v5 = vld [vmem:[#allocation2 + $0x10] sm:$0xff]  ;;  %v705_v6 = vld [vmem:[#allocation2 + $0x8] sm:$0xff]  ;;  %v704_v7 = vld [vmem:[#allocation2] sm:$0xff] }
  0x15   :  { %v703_v8 = vld [vmem:[%s942_s0] sm:$0xff]  ;;  %v719_v13 = vld [vmem:[#allocation4 + $0x38] sm:$0xff]  ;;  %v718_v16 = vld [vmem:[#allocation4 + $0x30] sm:$0xff] }
  0x16   :  { %293 = vmatpush.bf16.msra.mxu1 %v719_v13  ;;  %v717_v23 = vld [vmem:[#allocation4 + $0x28] sm:$0xff]  ;;  %v716_v29 = vld [vmem:[#allocation4 + $0x20] sm:$0xff]  ;;  %v715_v35 = vld [vmem:[#allocation4 + $0x18] sm:$0xff] }
  0x17   :  { %160 = vmatpush.bf16.msra.mxu0 %v710_v1  ;;  %v714_v40 = vld [vmem:[#allocation4 + $0x10] sm:$0xff]  ;;  %v713_v44 = vld [vmem:[#allocation4 + $0x8] sm:$0xff]  ;;  %v712_v46 = vld [vmem:[#allocation4] sm:$0xff] }
  0x18   :  { %v922_v53 = vld [vmem:[%s947_s5] sm:$0xff] }
  0x19   :  { %v744_v11 = vpop.eup %743 }
  0x1a   :  { %v181_v12 = vmul.f32 16.0, %v744_v11  ;;  %294 = vmatpush.bf16.msra.mxu1 %v718_v16  ;;  %vm185_vm0 = vweird.f32 %v744_v11  ;;  %v725_v16 = vld [vmem:[#allocation6 + $0x28] sm:$0xff] }
  0x1b   :  { %161 = vmatpush.bf16.msra.mxu0 %v709_v2 }
  0x1c   :  { %v182_v15 = vsub.f32 1.0, %v181_v12 }
  0x1e   :  { %v183_v22 = vmul.f32 %v744_v11, %v182_v15  ;;  %295 = vmatpush.bf16.msra.mxu1 %v717_v23 }
  0x1f   :  { %162 = vmatpush.bf16.msra.mxu0 %v708_v3 }
  0x20   :  { %v184_v28 = vadd.f32 %v744_v11, %v183_v22 }
  0x22   :  { %296 = vmatpush.bf16.msra.mxu1 %v716_v29  ;;  %v915_v34 = vsel %vm185_vm0, %v744_v11, %v184_v28  ;;  %v726_v11 = vld [vmem:[#allocation6 + $0x30] sm:$0xff] }
  0x23   :  { %163 = vmatpush.bf16.msra.mxu0 %v707_v4 }
  0x26   :  { %297 = vmatpush.bf16.msra.mxu1 %v715_v35 }
  0x27   :  { %164 = vmatpush.bf16.msra.mxu0 %v706_v5 }
  0x2a   :  { %298 = vmatpush.bf16.msra.mxu1 %v714_v40 }
  0x2b   :  { %165 = vmatpush.bf16.msra.mxu0 %v705_v6 }
  0x2e   :  { %299 = vmatpush.bf16.msra.mxu1 %v713_v44 }
  0x2f   :  { %166 = vmatpush.bf16.msra.mxu0 %v704_v7 }
  0x32   :  { %167 = vmatmul.bf16.vlgmr.msra.gmra.mxu0 %v703_v8  ;;  %300 = vmatpush.bf16.msra.mxu1 %v712_v46  ;;  %v727_v8 = vld [vmem:[#allocation6 + $0x38] sm:$0xff] }
  0x33   :  { %420 = vmatpush.bf16.msra.mxu2 %v727_v8  ;;  %v733_v8 = vld [vmem:[#allocation7 + $0x28] sm:$0xff] }
  0x37   :  { %421 = vmatpush.bf16.msra.mxu2 %v726_v11 }
  0x3b   :  { %422 = vmatpush.bf16.msra.mxu2 %v725_v16 }
  0xaf   :  { %v910_v10 = vpop.f32.mrf.mxu0 }
  0xb0   :  { %v188_v17 = vmul.f32 %v910_v10, %v910_v10 }
  0xb7   :  { %v170_v14 = vpop.f32.mrf.mxu0 }
  0xb8   :  { %v173_v18 = vadd.f32 %v170_v14, %v910_v10  ;;  %v189_v19 = vmul.f32 %v170_v14, %v170_v14 }
  0xba   :  { %v174_v20 = vrot.slane %v173_v18, 4  ;;  %v190_v21 = vadd.f32 %v189_v19, %v188_v17 }
  0xbc   :  { %v175_v24 = vadd.f32 %v174_v20, %v173_v18  ;;  %v191_v25 = vrot.slane %v190_v21, 4 }
  0xbe   :  { %v176_v26 = vrot.slane %v175_v24, 2  ;;  %v192_v27 = vadd.f32 %v191_v25, %v190_v21  ;;  %v724_v21 = vld [vmem:[#allocation6 + $0x20] sm:$0xff] }
  0xbf   :  { %423 = vmatpush.bf16.msra.mxu2 %v724_v21 }
  0xc0   :  { %v177_v30 = vadd.f32 %v176_v26, %v175_v24  ;;  %v193_v31 = vrot.slane %v192_v27, 2  ;;  %v723_v26 = vld [vmem:[#allocation6 + $0x18] sm:$0xff] }
  0xc2   :  { %v178_v32 = vrot.slane %v177_v30, 1  ;;  %v194_v33 = vadd.f32 %v193_v31, %v192_v27  ;;  %v722_v31 = vld [vmem:[#allocation6 + $0x10] sm:$0xff] }
  0xc3   :  { %424 = vmatpush.bf16.msra.mxu2 %v723_v26 }
  0xc4   :  { %v179_v36 = vadd.f32 %v178_v32, %v177_v30  ;;  %v195_v37 = vrot.slane %v194_v33, 1 }
  0xc6   :  { %v187_v38 = vmul.f32 %v915_v34, %v179_v36  ;;  %v196_v39 = vadd.f32 %v195_v37, %v194_v33  ;;  %v721_v36 = vld [vmem:[#allocation6 + $0x8] sm:$0xff] }
  0xc7   :  { %425 = vmatpush.bf16.msra.mxu2 %v722_v31 }
  0xc8   :  { %v197_v41 = vmul.f32 %v196_v39, %v915_v34  ;;  %v198_v42 = vmul.f32 %v187_v38, %v187_v38 }
  0xca   :  { %v199_v43 = vsub.f32 %v197_v41, %v198_v42 }
  0xcb   :  { %426 = vmatpush.bf16.msra.mxu2 %v721_v36 }
  0xcc   :  { %v200_v45 = vmax.f32 %v199_v43, 0.0 }
  0xce   :  { %v201_v47 = vadd.f32 1e-05, %v200_v45 }
  0xd0   :  { %745 = vrsqrt.f32 %v201_v47  ;;  %vm208_vm2 = vweird.f32 %v201_v47 }
  0xd6   :  { %v746_v48 = vpop.eup %745 }
  0xd7   :  { %v203_v49 = vmul.f32 %v746_v48, %v201_v47  ;;  %vm209_vm1 = vweird.f32 %v746_v48 }
  0xd8   :  { %vm210_vm3 = vmor %vm208_vm2, %vm209_vm1 }
  0xd9   :  { %v204_v50 = vmul.f32 %v746_v48, %v203_v49 }
  0xdb   :  { %v205_v51 = vmul.f32 0.5, %v204_v50 }
  0xdd   :  { %v206_v52 = vsub.f32 1.5, %v205_v51 }
  0xdf   :  { %v207_v54 = vmul.f32 %v746_v48, %v206_v52 }
  0xe1   :  { %v211_v55 = vsel %vm210_vm3, %v746_v48, %v207_v54 }
  0xe2   :  { %v212_v56 = vmul.f32 %v211_v55, %v922_v53 }
  0xe4   :  { %v213_v57 = vmul.f32 %v212_v56, %v187_v38  ;;  %v218_v59 = vperm.slane %v212_v56, 0  ;;  %v720_v38 = vld [vmem:[#allocation6] sm:$0xff] }
  0xe5   :  { %427 = vmatpush.bf16.msra.mxu2 %v720_v38 }
  0xe6   :  { %v215_v58 = vrot.slane %v213_v57, 7  ;;  %v219_v61 = vmul.f32 %v218_v59, %v910_v10  ;;  %v220_v62 = vmul.f32 %v218_v59, %v170_v14 }
  0xe8   :  { %v217_v60 = vsub.f32 %v922_v53, %v215_v58 }
  0xea   :  { %v221_v63 = vperm.slane %v217_v60, 1 }
  0xec   :  { %v223_v0 = vadd.f32 %v221_v63, %v220_v62  ;;  %v222_v1 = vadd.f32 %v221_v63, %v219_v61 }
  0xee   :  { %v224_v2 = vmul.f32 0.01, %v222_v1  ;;  %v225_v3 = vmul.f32 0.01, %v223_v0 }
  0xf0   :  { %v226_v4 = vmax.f32 %v222_v1, %v224_v2  ;;  %v227_v5 = vmax.f32 %v223_v0, %v225_v3  ;;  %v735_v0 = vld [vmem:[#allocation7 + $0x38] sm:$0xff]  ;;  %v734_v2 = vld [vmem:[#allocation7 + $0x30] sm:$0xff] }
  0xf1   :  { %548 = vmatpush.bf16.msra.mxu3 %v735_v0 }
  0xf2   :  { %v228_v6 = vpack.c.bf16 %v227_v5, %v226_v4 }
  0xf4   :  { %301 = vmatmul.bf16.vlgmr.msra.gmra.mxu1 %v228_v6 }
  0xf5   :  { %549 = vmatpush.bf16.msra.mxu3 %v734_v2 }
  0xf9   :  { %550 = vmatpush.bf16.msra.mxu3 %v733_v8 }
 0x171   :  { %v302_v7 = vpop.f32.mrf.mxu1 }
 0x172   :  { %v315_v12 = vmul.f32 %v302_v7, %v302_v7 }
 0x179   :  { %v304_v9 = vpop.f32.mrf.mxu1 }
 0x17a   :  { %v307_v13 = vadd.f32 %v304_v9, %v302_v7  ;;  %v316_v15 = vmul.f32 %v304_v9, %v304_v9 }
 0x17c   :  { %v308_v10 = vrot.slane %v307_v13, 4  ;;  %v317_v14 = vadd.f32 %v316_v15, %v315_v12  ;;  %v732_v15 = vld [vmem:[#allocation7 + $0x20] sm:$0xff] }
 0x17d   :  { %551 = vmatpush.bf16.msra.mxu3 %v732_v15 }
 0x17e   :  { %v309_v17 = vadd.f32 %v308_v10, %v307_v13  ;;  %v318_v18 = vrot.slane %v317_v14, 4 }
 0x180   :  { %v310_v19 = vrot.slane %v309_v17, 2  ;;  %v319_v20 = vadd.f32 %v318_v18, %v317_v14  ;;  %v731_v18 = vld [vmem:[#allocation7 + $0x18] sm:$0xff] }
 0x181   :  { %552 = vmatpush.bf16.msra.mxu3 %v731_v18 }
 0x182   :  { %v311_v22 = vadd.f32 %v310_v19, %v309_v17  ;;  %v320_v23 = vrot.slane %v319_v20, 2 }
 0x184   :  { %v312_v24 = vrot.slane %v311_v22, 1  ;;  %v321_v25 = vadd.f32 %v320_v23, %v319_v20  ;;  %v730_v23 = vld [vmem:[#allocation7 + $0x10] sm:$0xff] }
 0x185   :  { %553 = vmatpush.bf16.msra.mxu3 %v730_v23 }
 0x186   :  { %v313_v27 = vadd.f32 %v312_v24, %v311_v22  ;;  %v322_v28 = vrot.slane %v321_v25, 1 }
 0x188   :  { %v314_v29 = vmul.f32 %v313_v27, %v915_v34  ;;  %v323_v30 = vadd.f32 %v322_v28, %v321_v25  ;;  %v729_v27 = vld [vmem:[#allocation7 + $0x8] sm:$0xff] }
 0x189   :  { %554 = vmatpush.bf16.msra.mxu3 %v729_v27 }
 0x18a   :  { %v324_v32 = vmul.f32 %v323_v30, %v915_v34  ;;  %v325_v33 = vmul.f32 %v314_v29, %v314_v29 }
 0x18c   :  { %v326_v35 = vsub.f32 %v324_v32, %v325_v33 }
 0x18e   :  { %v327_v37 = vmax.f32 %v326_v35, 0.0 }
 0x190   :  { %v328_v39 = vadd.f32 1e-05, %v327_v37 }
 0x192   :  { %747 = vrsqrt.f32 %v328_v39  ;;  %vm335_vm5 = vweird.f32 %v328_v39 }
 0x198   :  { %v748_v40 = vpop.eup %747 }
 0x199   :  { %v330_v41 = vmul.f32 %v748_v40, %v328_v39  ;;  %vm336_vm4 = vweird.f32 %v748_v40 }
 0x19a   :  { %vm337_vm6 = vmor %vm335_vm5, %vm336_vm4 }
 0x19b   :  { %v331_v42 = vmul.f32 %v748_v40, %v330_v41 }
 0x19d   :  { %v332_v43 = vmul.f32 0.5, %v331_v42 }
 0x19f   :  { %v333_v44 = vsub.f32 1.5, %v332_v43 }
 0x1a1   :  { %v334_v45 = vmul.f32 %v748_v40, %v333_v44 }
 0x1a3   :  { %v338_v46 = vsel %vm337_vm6, %v748_v40, %v334_v45 }
 0x1a4   :  { %v339_v47 = vmul.f32 %v338_v46, %v922_v53 }
 0x1a6   :  { %v340_v48 = vmul.f32 %v339_v47, %v314_v29  ;;  %v345_v50 = vperm.slane %v339_v47, 2  ;;  %v728_v29 = vld [vmem:[#allocation7] sm:$0xff] }
 0x1a7   :  { %555 = vmatpush.bf16.msra.mxu3 %v728_v29 }
 0x1a8   :  { %v342_v49 = vrot.slane %v340_v48, 7  ;;  %v346_v52 = vmul.f32 %v345_v50, %v302_v7  ;;  %v347_v54 = vmul.f32 %v345_v50, %v304_v9 }
 0x1aa   :  { %v344_v51 = vsub.f32 %v922_v53, %v342_v49 }
 0x1ac   :  { %v348_v55 = vperm.slane %v344_v51, 3 }
 0x1ae   :  { %v350_v56 = vadd.f32 %v348_v55, %v347_v54  ;;  %v349_v57 = vadd.f32 %v348_v55, %v346_v52  ;;  %v499_v54 = vperm.slane %v922_v53, 6 }
 0x1b0   :  { %v351_v58 = vmul.f32 0.01, %v349_v57  ;;  %v352_v59 = vmul.f32 0.01, %v350_v56 }
 0x1b2   :  { %v353_v60 = vmax.f32 %v349_v57, %v351_v58  ;;  %v354_v61 = vmax.f32 %v350_v56, %v352_v59 }
 0x1b4   :  { %v355_v62 = vpack.c.bf16 %v354_v61, %v353_v60 }
 0x1b6   :  { %428 = vmatmul.bf16.vlgmr.msra.gmra.mxu2 %v355_v62 }
 0x239   :  { %v429_v63 = vpop.f32.mrf.mxu2 }
 0x23a   :  { %v442_v3 = vmul.f32 %v429_v63, %v429_v63 }
 0x241   :  { %v431_v1 = vpop.f32.mrf.mxu2 }
 0x242   :  { %v434_v4 = vadd.f32 %v431_v1, %v429_v63  ;;  %v443_v5 = vmul.f32 %v431_v1, %v431_v1 }
 0x244   :  { %v435_v6 = vrot.slane %v434_v4, 4  ;;  %v444_v7 = vadd.f32 %v443_v5, %v442_v3 }
 0x246   :  { %v436_v9 = vadd.f32 %v435_v6, %v434_v4  ;;  %v445_v11 = vrot.slane %v444_v7, 4 }
 0x248   :  { %v437_v12 = vrot.slane %v436_v9, 2  ;;  %v446_v13 = vadd.f32 %v445_v11, %v444_v7 }
 0x24a   :  { %v438_v10 = vadd.f32 %v437_v12, %v436_v9  ;;  %v447_v14 = vrot.slane %v446_v13, 2 }
 0x24c   :  { %v439_v16 = vrot.slane %v438_v10, 1  ;;  %v448_v17 = vadd.f32 %v447_v14, %v446_v13 }
 0x24e   :  { %v440_v19 = vadd.f32 %v439_v16, %v438_v10  ;;  %v449_v20 = vrot.slane %v448_v17, 1 }
 0x250   :  { %v441_v21 = vmul.f32 %v440_v19, %v915_v34  ;;  %v450_v22 = vadd.f32 %v449_v20, %v448_v17 }
 0x252   :  { %v451_v24 = vmul.f32 %v450_v22, %v915_v34  ;;  %v452_v25 = vmul.f32 %v441_v21, %v441_v21 }
 0x254   :  { %v453_v26 = vsub.f32 %v451_v24, %v452_v25 }
 0x256   :  { %v454_v28 = vmax.f32 %v453_v26, 0.0 }
 0x258   :  { %v455_v30 = vadd.f32 1e-05, %v454_v28 }
 0x25a   :  { %749 = vrsqrt.f32 %v455_v30  ;;  %vm462_vm8 = vweird.f32 %v455_v30 }
 0x260   :  { %v750_v31 = vpop.eup %749 }
 0x261   :  { %v457_v32 = vmul.f32 %v750_v31, %v455_v30  ;;  %vm463_vm7 = vweird.f32 %v750_v31 }
 0x262   :  { %vm464_vm9 = vmor %vm462_vm8, %vm463_vm7 }
 0x263   :  { %v458_v33 = vmul.f32 %v750_v31, %v457_v32 }
 0x265   :  { %v459_v35 = vmul.f32 0.5, %v458_v33 }
 0x267   :  { %v460_v36 = vsub.f32 1.5, %v459_v35 }
 0x269   :  { %v461_v37 = vmul.f32 %v750_v31, %v460_v36 }
 0x26b   :  { %v465_v34 = vsel %vm464_vm9, %v750_v31, %v461_v37 }
 0x26c   :  { %v466_v38 = vmul.f32 %v465_v34, %v922_v53 }
 0x26e   :  { %v467_v39 = vmul.f32 %v466_v38, %v441_v21  ;;  %v472_v41 = vperm.slane %v466_v38, 4 }
 0x270   :  { %v469_v40 = vrot.slane %v467_v39, 7  ;;  %v473_v43 = vmul.f32 %v472_v41, %v429_v63  ;;  %v474_v44 = vmul.f32 %v472_v41, %v431_v1 }
 0x272   :  { %v471_v42 = vsub.f32 %v922_v53, %v469_v40 }
 0x274   :  { %v475_v45 = vperm.slane %v471_v42, 5 }
 0x276   :  { %v477_v46 = vadd.f32 %v475_v45, %v474_v44  ;;  %v476_v47 = vadd.f32 %v475_v45, %v473_v43 }
 0x278   :  { %v478_v48 = vmul.f32 0.01, %v476_v47  ;;  %v479_v49 = vmul.f32 0.01, %v477_v46 }
 0x27a   :  { %v480_v50 = vmax.f32 %v476_v47, %v478_v48  ;;  %v481_v51 = vmax.f32 %v477_v46, %v479_v49 }
 0x27c   :  { %v482_v52 = vpack.c.bf16 %v481_v51, %v480_v50 }
 0x27e   :  { %556 = vmatmul.bf16.vlgmr.msra.gmra.mxu3 %v482_v52 }
 0x301   :  { %v557_v55 = vpop.f32.mrf.mxu3 }
 0x302   :  { %v558_v56 = vadd.f32 %v557_v55, %v499_v54 }
 0x304   :  { %562 = vst [vmem:[%s948_s6] sm:$0xff] %v558_v56 }
 0x309   :  { %v559_v57 = vpop.f32.mrf.mxu3 }
 0x30a   :  { %v560_v58 = vadd.f32 %v559_v57, %v499_v54 }
 0x30c   :  { %563 = vst [vmem:[%s948_s6 + $0x8] sm:$0xff] %v560_v58 }
 0x30d   :  { %568 = vsyncpa [#allocation3], 1 }
 0x30e   :  { %569 = vsyncpa [#allocation5], 1 }
 0x30f   :  { %570 = vsyncpa [#allocation8], 1 }

</bundles_post_ra>
